<compile_context>
chip_gen: v7x
topology: tpu7x:2x2x1
jax: 0.10.0
libtpu: 0.0.40
codegen_flags: <defaults>
</compile_context>

<pallas_src>
import functools
import math

import jax
import jax.numpy as jnp
from jax import lax
from jax.experimental import pallas as pl
from jax.experimental.pallas import tpu as pltpu


# ----------------------------------------------------------------------------
# Kernel 1: fused input projection + swish  ->  u, v, z  (lane-dense outputs)
# ----------------------------------------------------------------------------
def _gau_proj_kernel(h_ref, wu_ref, wv_ref, wz_ref, u_ref, v_ref, z_ref):
    h = h_ref[...].astype(jnp.bfloat16)          # (tq, H)
    wu = wu_ref[...].astype(jnp.bfloat16)        # (H, E)
    wv = wv_ref[...].astype(jnp.bfloat16)        # (H, E)
    wz = wz_ref[...].astype(jnp.bfloat16)        # (H, S)

    xu = jnp.dot(h, wu, preferred_element_type=jnp.float32)   # (tq, E) f32
    xv = jnp.dot(h, wv, preferred_element_type=jnp.float32)   # (tq, E) f32
    xz = jnp.dot(h, wz, preferred_element_type=jnp.float32)   # (tq, S) f32

    # swish / SiLU in f32 on VPU/EUP
    u_ref[...] = (xu * jax.nn.sigmoid(xu)).astype(u_ref.dtype)
    v_ref[...] = (xv * jax.nn.sigmoid(xv)).astype(v_ref.dtype)
    z_ref[...] = (xz * jax.nn.sigmoid(xz)).astype(z_ref.dtype)


# ----------------------------------------------------------------------------
# Kernel 2: flash-style attention + gate + output projection
#   grid = (B, N//tq, N//tk), kv axis last ("arbitrary"), scratch accumulators.
# ----------------------------------------------------------------------------
def _gau_attn_kernel(u_ref, v_ref, zq_ref, zk_ref, scale_ref, wo_ref, o_ref,
                     m_sc, l_sc, acc_sc):
    kv = pl.program_id(2)

    @pl.when(kv == 0)
    def _():
        m_sc[...] = jnp.full_like(m_sc, -jnp.inf)
        l_sc[...] = jnp.zeros_like(l_sc)
        acc_sc[...] = jnp.zeros_like(acc_sc)

    # Combined pre-score scale folds gamma_q*gamma_k*rsqrt(S)*log(N)/log(512).
    zq = (zq_ref[...] * scale_ref[...]).astype(jnp.bfloat16)   # (tq, S)
    zk = zk_ref[...].astype(jnp.bfloat16)                      # (tk, S)

    # Contract on last dims of both operands -> no explicit transpose.
    s = lax.dot_general(zq, zk, (((1,), (1,)), ((), ())),
                        preferred_element_type=jnp.float32)    # (tq, tk) f32

    # online softmax update
    m_prev = m_sc[...]
    m_new = jnp.maximum(m_prev, jnp.max(s, axis=-1, keepdims=True))
    alpha = jnp.exp(m_prev - m_new)
    p = jnp.exp(s - m_new)                                     # (tq, tk) f32
    l_sc[...] = alpha * l_sc[...] + jnp.sum(p, axis=-1, keepdims=True)
    acc_sc[...] = alpha * acc_sc[...] + jnp.dot(
        p.astype(jnp.bfloat16), v_ref[...].astype(jnp.bfloat16),
        preferred_element_type=jnp.float32)                    # (tq, E)
    m_sc[...] = m_new

    @pl.when(kv == pl.num_programs(2) - 1)
    def _():
        inv_l = pl.reciprocal(l_sc[...], approx=True)          # EUP slot
        gated = (u_ref[...] * acc_sc[...] * inv_l).astype(jnp.bfloat16)  # (tq, E)
        o_ref[...] = jnp.dot(gated, wo_ref[...].astype(jnp.bfloat16),
                             preferred_element_type=jnp.float32
                             ).astype(o_ref.dtype)             # (tq, H)


# ----------------------------------------------------------------------------
# Wrapper
# ----------------------------------------------------------------------------
def gated_attention_unit(hidden_states, wi_t, wo_t, q_scale, k_scale,
                         *, intermediate_size, attention_key_size,
                         q_tile=256, kv_tile=512):
    B, N, H = hidden_states.shape
    E = intermediate_size
    S = attention_key_size
    assert wi_t.shape == (H, 2 * E + S)
    assert wo_t.shape == (E, H)

    tq = min(q_tile, N)
    tk = min(kv_tile, N)
    assert N % tq == 0 and N % tk == 0, "sequence length must divide the tiles"

    # Split i_dense weights once in the wrapper (lane-dense per-output weights).
    wu = wi_t[:, :E]
    wv = wi_t[:, E:2 * E]
    wz = wi_t[:, 2 * E:]

    # Combined pre-score scale (exact algebra): applied to the q-side z only.
    comb_scale = (q_scale * k_scale
                  * (1.0 / math.sqrt(S))
                  * (math.log(N) / math.log(512.0))).astype(jnp.float32)  # (1, S)

    # ---- Kernel 1: projection + swish ----
    proj_flops = 2 * B * N * H * (2 * E + S)
    proj_cost = pl.CostEstimate(
        flops=proj_flops,
        transcendentals=B * N * (2 * E + S),
        bytes_accessed=4 * (B * N * H + H * (2 * E + S) + B * N * (2 * E + S)),
    )
    u, v, z = pl.pallas_call(
        _gau_proj_kernel,
        out_shape=(
            jax.ShapeDtypeStruct((B, N, E), jnp.float32),
            jax.ShapeDtypeStruct((B, N, E), jnp.float32),
            jax.ShapeDtypeStruct((B, N, S), jnp.float32),
        ),
        grid_spec=pltpu.PrefetchScalarGridSpec(
            num_scalar_prefetch=0,
            grid=(B, N // tq),
            in_specs=[
                pl.BlockSpec((pl.Squeezed(), tq, H), lambda b, i: (b, i, 0)),
                pl.BlockSpec((H, E), lambda b, i: (0, 0)),
                pl.BlockSpec((H, E), lambda b, i: (0, 0)),
                pl.BlockSpec((H, S), lambda b, i: (0, 0)),
            ],
            out_specs=[
                pl.BlockSpec((pl.Squeezed(), tq, E), lambda b, i: (b, i, 0)),
                pl.BlockSpec((pl.Squeezed(), tq, E), lambda b, i: (b, i, 0)),
                pl.BlockSpec((pl.Squeezed(), tq, S), lambda b, i: (b, i, 0)),
            ],
        ),
        compiler_params=pltpu.CompilerParams(
            dimension_semantics=("parallel", "parallel"),
        ),
        cost_estimate=proj_cost,
    )(hidden_states, wu, wv, wz)

    # ---- Kernel 2: flash attention + gate + output projection ----
    attn_flops = 2 * B * N * N * (S + E) + 2 * B * N * E * H
    attn_cost = pl.CostEstimate(
        flops=attn_flops,
        transcendentals=B * N * N,
        bytes_accessed=4 * (B * N * (2 * E + 2 * S) + E * H + S + B * N * H),
    )
    out = pl.pallas_call(
        _gau_attn_kernel,
        out_shape=jax.ShapeDtypeStruct((B, N, H), hidden_states.dtype),
        grid_spec=pltpu.PrefetchScalarGridSpec(
            num_scalar_prefetch=0,
            grid=(B, N // tq, N // tk),
            in_specs=[
                pl.BlockSpec((pl.Squeezed(), tq, E), lambda b, qi, ki: (b, qi, 0)),  # u
                pl.BlockSpec((pl.Squeezed(), tk, E), lambda b, qi, ki: (b, ki, 0)),  # v
                pl.BlockSpec((pl.Squeezed(), tq, S), lambda b, qi, ki: (b, qi, 0)),  # z (query side)
                pl.BlockSpec((pl.Squeezed(), tk, S), lambda b, qi, ki: (b, ki, 0)),  # z (key side)
                pl.BlockSpec((1, S), lambda b, qi, ki: (0, 0)),                      # combined scale
                pl.BlockSpec((E, H), lambda b, qi, ki: (0, 0)),                      # W_o
            ],
            out_specs=pl.BlockSpec((pl.Squeezed(), tq, H),
                                   lambda b, qi, ki: (b, qi, 0)),
            scratch_shapes=[
                pltpu.VMEM((tq, 1), jnp.float32),   # running max
                pltpu.VMEM((tq, 1), jnp.float32),   # running sum
                pltpu.VMEM((tq, E), jnp.float32),   # output accumulator
            ],
        ),
        compiler_params=pltpu.CompilerParams(
            dimension_semantics=("parallel", "parallel", "arbitrary"),
        ),
        cost_estimate=attn_cost,
    )(u, v, z, z, comb_scale, wo_t)

    return out


# ----------------------------------------------------------------------------
# Pure-JAX reference mirroring the PyTorch forward (eval mode)
# ----------------------------------------------------------------------------
def gau_reference(hidden_states, wi_t, wo_t, q_scale, k_scale,
                  *, intermediate_size, attention_key_size):
    E, S = intermediate_size, attention_key_size
    N = hidden_states.shape[1]
    x = jnp.einsum('bnh,hf->bnf', hidden_states, wi_t)
    xact = x * jax.nn.sigmoid(x)
    u, v, z = xact[..., :E], xact[..., E:2 * E], xact[..., 2 * E:]
    q = z * q_scale[0]
    k = z * k_scale[0]
    a = jnp.einsum('bmd,bnd->bmn', q, k) / math.sqrt(S)
    a = a * (math.log(N) / math.log(512.0))
    A = jax.nn.softmax(a, axis=-1)
    o = jnp.einsum('bme,eh->bmh', u * jnp.einsum('bmn,bne->bme', A, v), wo_t)
    return o


if __name__ == "__main__":
    # Small, module-consistent shapes.
    B, N, H = 2, 16, 32          # batch, seq, hidden_size
    E, S = 64, 32                # intermediate_size, attention_key_size

    key = jax.random.PRNGKey(0)
    k_h, k_wi, k_wo = jax.random.split(key, 3)

    hidden_states = jax.random.normal(k_h, (B, N, H), dtype=jnp.float32)

    # Parameter shapes per GatedAttentionUnit.__init__:
    #   i_dense.weight : (2E+S, H)  -> pass transposed (H, 2E+S)
    #   o_dense.weight : (H, E)     -> pass transposed (E, H)
    #   q/k ScaleOffset.weight = ones(S)  (offset disabled, use_bias=False)
    wi_t = jax.random.normal(k_wi, (H, 2 * E + S), dtype=jnp.float32) * 0.05
    wo_t = jax.random.normal(k_wo, (E, H), dtype=jnp.float32) * 0.05
    q_scale = jnp.ones((1, S), dtype=jnp.float32)
    k_scale = jnp.ones((1, S), dtype=jnp.float32)

    # Small tiles here to exercise the multi-tile online-softmax path
    # (production defaults: q_tile=256, kv_tile=512).
    out = gated_attention_unit(
        hidden_states, wi_t, wo_t, q_scale, k_scale,
        intermediate_size=E, attention_key_size=S,
        q_tile=8, kv_tile=8,
    )
    out = jax.block_until_ready(out)

    ref = gau_reference(
        hidden_states, wi_t, wo_t, q_scale, k_scale,
        intermediate_size=E, attention_key_size=S,
    )
    ref = jax.block_until_ready(ref)

    assert out.shape == (B, N, H)
    # bf16 MXU inputs + online softmax summation order -> loosen tolerance a bit.
    assert jnp.allclose(out, ref, atol=1e-2, rtol=1e-2), (
        f"max abs diff = {jnp.max(jnp.abs(out - ref))}")

    print("KERNEL_OK")
</pallas_src>

<mosaic_0001>
module attributes {stable_mosaic.version = 11 : i64} {
  func.func @_gau_proj_kernel(%arg0: i32, %arg1: i32, %arg2: memref<1x8x32xf32, #tpu.memory_space<vmem>>, %arg3: memref<32x64xf32, #tpu.memory_space<vmem>>, %arg4: memref<32x64xf32, #tpu.memory_space<vmem>>, %arg5: memref<32x32xf32, #tpu.memory_space<vmem>>, %arg6: memref<1x8x64xf32, #tpu.memory_space<vmem>>, %arg7: memref<1x8x64xf32, #tpu.memory_space<vmem>>, %arg8: memref<1x8x32xf32, #tpu.memory_space<vmem>>) attributes {dimension_semantics = [#tpu.dimension_semantics<parallel>, #tpu.dimension_semantics<parallel>], iteration_bounds = array<i64: 2, 2>, scalar_prefetch = 0 : i64, scratch_operands = 0 : i64, tpu.core_type = #tpu.core_type<tc>, window_params = [{transform_indices = @transform_0, window_bounds = array<i64: 1, 8, 32>}, {pipeline_mode = #tpu.pipeline_mode<synchronous>, transform_indices = @transform_1, window_bounds = array<i64: 32, 64>}, {pipeline_mode = #tpu.pipeline_mode<synchronous>, transform_indices = @transform_2, window_bounds = array<i64: 32, 64>}, {pipeline_mode = #tpu.pipeline_mode<synchronous>, transform_indices = @transform_3, window_bounds = array<i64: 32, 32>}, {transform_indices = @transform_4, window_bounds = array<i64: 1, 8, 64>}, {transform_indices = @transform_5, window_bounds = array<i64: 1, 8, 64>}, {transform_indices = @transform_6, window_bounds = array<i64: 1, 8, 32>}]} {
    %c0 = arith.constant 0 : index
    %c0_0 = arith.constant 0 : index
    %c0_1 = arith.constant 0 : index
    %0 = vector.load %arg2[%c0, %c0_0, %c0_1] : memref<1x8x32xf32, #tpu.memory_space<vmem>>, vector<1x8x32xf32>
    %1 = vector.shape_cast %0 : vector<1x8x32xf32> to vector<8x32xf32>
    %2 = arith.truncf %1 : vector<8x32xf32> to vector<8x32xbf16>
    %c0_2 = arith.constant 0 : index
    %c0_3 = arith.constant 0 : index
    %3 = vector.load %arg3[%c0_2, %c0_3] : memref<32x64xf32, #tpu.memory_space<vmem>>, vector<32x64xf32>
    %4 = arith.truncf %3 : vector<32x64xf32> to vector<32x64xbf16>
    %c0_4 = arith.constant 0 : index
    %c0_5 = arith.constant 0 : index
    %5 = vector.load %arg4[%c0_4, %c0_5] : memref<32x64xf32, #tpu.memory_space<vmem>>, vector<32x64xf32>
    %6 = arith.truncf %5 : vector<32x64xf32> to vector<32x64xbf16>
    %c0_6 = arith.constant 0 : index
    %c0_7 = arith.constant 0 : index
    %7 = vector.load %arg5[%c0_6, %c0_7] : memref<32x32xf32, #tpu.memory_space<vmem>>, vector<32x32xf32>
    %8 = arith.truncf %7 : vector<32x32xf32> to vector<32x32xbf16>
    %cst = arith.constant dense<0.000000e+00> : vector<8x64xf32>
    %9 = tpu.matmul %2, %4, %cst {dimension_numbers = #tpu.dot_dimension_numbers<[1], [0], [0], [1], [0, 0, 1, 1], [], []>} : vector<8x32xbf16>, vector<32x64xbf16>, vector<8x64xf32> -> vector<8x64xf32>
    %cst_8 = arith.constant dense<0.000000e+00> : vector<8x64xf32>
    %10 = tpu.matmul %2, %6, %cst_8 {dimension_numbers = #tpu.dot_dimension_numbers<[1], [0], [0], [1], [0, 0, 1, 1], [], []>} : vector<8x32xbf16>, vector<32x64xbf16>, vector<8x64xf32> -> vector<8x64xf32>
    %cst_9 = arith.constant dense<0.000000e+00> : vector<8x32xf32>
    %11 = tpu.matmul %2, %8, %cst_9 {dimension_numbers = #tpu.dot_dimension_numbers<[1], [0], [0], [1], [0, 0, 1, 1], [], []>} : vector<8x32xbf16>, vector<32x32xbf16>, vector<8x32xf32> -> vector<8x32xf32>
    %12 = arith.negf %9 : vector<8x64xf32>
    %13 = math.exp %12 : vector<8x64xf32>
    %cst_10 = arith.constant 1.000000e+00 : f32
    %14 = vector.broadcast %cst_10 : f32 to vector<8x64xf32>
    %15 = arith.addf %14, %13 : vector<8x64xf32>
    %16 = arith.divf %14, %15 : vector<8x64xf32>
    %17 = arith.mulf %9, %16 : vector<8x64xf32>
    %c0_11 = arith.constant 0 : index
    %c0_12 = arith.constant 0 : index
    %c0_13 = arith.constant 0 : index
    %18 = vector.load %arg6[%c0_11, %c0_12, %c0_13] : memref<1x8x64xf32, #tpu.memory_space<vmem>>, vector<1x8x64xf32>
    %19 = vector.shape_cast %18 : vector<1x8x64xf32> to vector<8x64xf32>
    %20 = vector.shape_cast %17 : vector<8x64xf32> to vector<1x8x64xf32>
    tpu.vector_store %arg6[%c0_11, %c0_12, %c0_13], %20 {strides = array<i32>} : memref<1x8x64xf32, #tpu.memory_space<vmem>>, vector<1x8x64xf32>,
    %21 = arith.negf %10 : vector<8x64xf32>
    %22 = math.exp %21 : vector<8x64xf32>
    %cst_14 = arith.constant 1.000000e+00 : f32
    %23 = vector.broadcast %cst_14 : f32 to vector<8x64xf32>
    %24 = arith.addf %23, %22 : vector<8x64xf32>
    %25 = arith.divf %23, %24 : vector<8x64xf32>
    %26 = arith.mulf %10, %25 : vector<8x64xf32>
    %c0_15 = arith.constant 0 : index
    %c0_16 = arith.constant 0 : index
    %c0_17 = arith.constant 0 : index
    %27 = vector.load %arg7[%c0_15, %c0_16, %c0_17] : memref<1x8x64xf32, #tpu.memory_space<vmem>>, vector<1x8x64xf32>
    %28 = vector.shape_cast %27 : vector<1x8x64xf32> to vector<8x64xf32>
    %29 = vector.shape_cast %26 : vector<8x64xf32> to vector<1x8x64xf32>
    tpu.vector_store %arg7[%c0_15, %c0_16, %c0_17], %29 {strides = array<i32>} : memref<1x8x64xf32, #tpu.memory_space<vmem>>, vector<1x8x64xf32>,
    %30 = arith.negf %11 : vector<8x32xf32>
    %31 = math.exp %30 : vector<8x32xf32>
    %cst_18 = arith.constant 1.000000e+00 : f32
    %32 = vector.broadcast %cst_18 : f32 to vector<8x32xf32>
    %33 = arith.addf %32, %31 : vector<8x32xf32>
    %34 = arith.divf %32, %33 : vector<8x32xf32>
    %35 = arith.mulf %11, %34 : vector<8x32xf32>
    %c0_19 = arith.constant 0 : index
    %c0_20 = arith.constant 0 : index
    %c0_21 = arith.constant 0 : index
    %36 = vector.load %arg8[%c0_19, %c0_20, %c0_21] : memref<1x8x32xf32, #tpu.memory_space<vmem>>, vector<1x8x32xf32>
    %37 = vector.shape_cast %36 : vector<1x8x32xf32> to vector<8x32xf32>
    %38 = vector.shape_cast %35 : vector<8x32xf32> to vector<1x8x32xf32>
    tpu.vector_store %arg8[%c0_19, %c0_20, %c0_21], %38 {strides = array<i32>} : memref<1x8x32xf32, #tpu.memory_space<vmem>>, vector<1x8x32xf32>,
    return
  }
  func.func @transform_0(%arg0: i32, %arg1: i32) -> (i32, i32, i32) {
    %c0_i32 = arith.constant 0 : i32
    %c0_i32_0 = arith.constant 0 : i32
    return %arg0, %arg1, %c0_i32 : i32, i32, i32
  }
  func.func @transform_1(%arg0: i32, %arg1: i32) -> (i32, i32) {
    %c0_i32 = arith.constant 0 : i32
    %c0_i32_0 = arith.constant 0 : i32
    %c0_i32_1 = arith.constant 0 : i32
    return %c0_i32, %c0_i32_0 : i32, i32
  }
  func.func @transform_2(%arg0: i32, %arg1: i32) -> (i32, i32) {
    %c0_i32 = arith.constant 0 : i32
    %c0_i32_0 = arith.constant 0 : i32
    %c0_i32_1 = arith.constant 0 : i32
    return %c0_i32, %c0_i32_0 : i32, i32
  }
  func.func @transform_3(%arg0: i32, %arg1: i32) -> (i32, i32) {
    %c0_i32 = arith.constant 0 : i32
    %c0_i32_0 = arith.constant 0 : i32
    %c0_i32_1 = arith.constant 0 : i32
    return %c0_i32, %c0_i32_0 : i32, i32
  }
  func.func @transform_4(%arg0: i32, %arg1: i32) -> (i32, i32, i32) {
    %c0_i32 = arith.constant 0 : i32
    %c0_i32_0 = arith.constant 0 : i32
    return %arg0, %arg1, %c0_i32 : i32, i32, i32
  }
  func.func @transform_5(%arg0: i32, %arg1: i32) -> (i32, i32, i32) {
    %c0_i32 = arith.constant 0 : i32
    %c0_i32_0 = arith.constant 0 : i32
    return %arg0, %arg1, %c0_i32 : i32, i32, i32
  }
  func.func @transform_6(%arg0: i32, %arg1: i32) -> (i32, i32, i32) {
    %c0_i32 = arith.constant 0 : i32
    %c0_i32_0 = arith.constant 0 : i32
    return %arg0, %arg1, %c0_i32 : i32, i32, i32
  }
}

</mosaic_0001>

<bundles_post_ra>
// kernel: tpu_custom_call.1
= control target key start
LH: loop header
LB: loop body
LE: loop exit
PB: predicated region body
PF: predicated region fallthrough
CT: control target
= control target key end

     0   :  { %s1678_s0 = inlined_call_operand.hbm [shape: f32[2,16,32], index: 0, kind: input, shape index: {}]   ;;  %s1679_s1 = inlined_call_operand.hbm [shape: f32[32,64], index: 1, kind: input, shape index: {}]   ;;  %s1680_s2 = inlined_call_operand.hbm [shape: f32[32,64], index: 2, kind: input, shape index: {}]   ;;  %s1681_s3 = inlined_call_operand.hbm [shape: f32[32,32], index: 3, kind: input, shape index: {}]   ;;  %s1682_s4 = inlined_call_operand.hbm [shape: f32[2,16,64], index: 4, kind: output, shape index: {0}]   ;;  %s1683_s5 = inlined_call_operand.hbm [shape: f32[2,16,64], index: 5, kind: output, shape index: {1}]   ;;  %s1684_s6 = inlined_call_operand.hbm [shape: f32[2,16,32], index: 6, kind: output, shape index: {2}]  }
   0x1   :  { %1693 = sst [smem:[#allocation21_spill]] %s1679_s1 }
   0x2   :  { %1694 = sst [smem:[#allocation22_spill]] %s1680_s2 }
   0x3   :  { %1695 = sst [smem:[#allocation23_spill]] %s1681_s3 }
   0x4   :  { %1696 = sst [smem:[#allocation24_spill]] %s1683_s5 }
   0x5   :  { %1697 = sst [smem:[#allocation25_spill]] %s1684_s6 }
   0x6   :  { %12 = vsyncpa [#allocation3], 0 }
   0x7   :  { %14 = vsyncpa [#allocation3 + $0x1], 0 }
   0x8   :  { %15 = vsyncpa [#allocation6], 0 }
   0x9   :  { %16 = vsyncpa [#allocation9], 0 }
   0xa   :  { %17 = vsyncpa [#allocation4], 0 }
   0xb   :  { %19 = vsyncpa [#allocation4 + $0x1], 0 }
   0xc   :  { %20 = vsyncpa [#allocation12], 0 }
   0xd   :  { %22 = vsyncpa [#allocation12 + $0x1], 0  ;;  %s1287_s21 = smov 0   ;;  %s1289_s22 = smov 0  }
   0xe   :  { %s1291_s23 = smov 0   ;;  %s1293_s24 = smov 0  }
   0xf   :  { %s1295_s25 = smov 0   ;;  %s1297_s26 = smov 0  }
  0x10   :  { %s1299_s27 = smov 0   ;;  %s1301_s28 = smov 0  }
  0x11 LB: > { %1698 = sst [smem:[#allocation19_spill]] %s1211_s21  ;;  %s1328_s29 = sadd.s32 4294967295, %s1239_s28   ;;  %s1239_s28 = sphi %s1301_s28, %s28_s28   ;;  %s1235_s27 = sphi %s1299_s27, %s1730_s27   ;;  %s1231_s26 = sphi %s1297_s26, %s1729_s26   ;;  %s1227_s25 = sphi %s1295_s25, %s1728_s25   ;;  %s1223_s24 = sphi %s1293_s24, %s1727_s24   ;;  %s1219_s23 = sphi %s1291_s23, %s1726_s23   ;;  %s1215_s22 = sphi %s1289_s22, %s1725_s22   ;;  %s1211_s21 = sphi %s1287_s21, %s1724_s21  }
  0x12   : > { %s1685_s30 = sadd.s32 4294967294, %s1239_s28   ;;  %p62_p0 = scmp.ne.s32.totalorder %s1215_s22, %s1211_s21 }
  0x13   : > { %p1686_p1 = scmp.eq.s32.totalorder %s1328_s29, 0  ;;  %p157_p3 = scmp.eq.s32.totalorder %s1685_s30, 3 }
  0x14   : > { %p758_p5 = scmp.ge.s32.totalorder %s1239_s28, 1  ;;  %p220_p7 = scmp.lt.s32.totalorder %s1239_s28, 5 }
  0x15   : > { %p1339_p4 = por %p1686_p1, %p62_p0  ;;  %p1344_p6 = por %p157_p3, %p62_p0 }
  0x16   : > { %p1349_p8 = pnand %p758_p5, %p220_p7  ;;  %s1241_s10 = smov [#allocation5]  }
  0x17   : > { %s1699_s7 = scalar_select %p1339_p4, 1, 0 }
  0x18   : > { %s1700_s8 = scalar_select %p1344_p6, 1, 0 }
  0x19   : > { %s1702_s9 = scalar_select %p1349_p8, 1, 0 }
  0x1a   : > { %1701 = sst [smem:[#allocation20_spill]] %s1700_s8  ;;  %s232_s11 = sshll.u32 %s1241_s10, 4  ;;  %s1353_s11 = int_to_ptr.vmem [resolvable:$true] %s232_s11 }
  0x1b   : > { %p844_p9 = pneg %p1349_p8  ;;  %s1242_s13 = smov [#allocation7]  }
  0x1c   : > { %s245_s14 = sshll.u32 %s1242_s13, 4  ;;  %s1243_s15 = smov [#allocation8]   ;;  %s1363_s14 = int_to_ptr.vmem [resolvable:$true] %s245_s14 }
  0x1d   : > { %p1359_p10 = pnand %p844_p9, %p1686_p1  ;;  %s1365_s16 = sshll.u32 %s1243_s15, 4  ;;  %s259_s16 = int_to_ptr.vmem [resolvable:$true] %s1365_s16 }
  0x1e   : > { %s1704_s1 = sld [smem:[#allocation21_spill]] }
  0x1f   : > { %p1375_p12 = pneg %p1359_p10 }
  0x24   : > { %s959_s19 = scalar_lea.hbm %s1704_s1, 512 }
  0x25   : > { %p960_p11 = scmp.ne.s32.totalorder %s1704_s1, %s959_s19  ;;  %p966_p3 = scmp.lt.u32.totalorder %s959_s19, %s1704_s1 }
  0x27   : > { %p962_p13 = pnand %p1375_p12, %p960_p11 }
  0x29   : > { %p963_p0 = pneg %p962_p13 }
  0x2b   : > { %p968_p5 = pnand %p966_p3, %p963_p0 }
  0x2d   : > { %971 = shalt.err (!%p968_p5)
}
  0x2e   : > { %s972_s17 = scalar_lea.vmem %s1353_s11, 512  ;;  %p980_p2 = scmp.lt.s32.totalorder %s1353_s11, %s1353_s11 }
  0x2f   : > { %p973_p7 = scmp.ne.s32.totalorder %s1353_s11, %s972_s17  ;;  %p981_p6 = scmp.lt.s32.totalorder %s972_s17, %s972_s17 }
  0x31   : > { %p975_p9 = pnand %p973_p7, %p1375_p12  ;;  %p982_p11 = por %p981_p6, %p980_p2 }
  0x33   : > { %p976_p1 = pneg %p975_p9 }
  0x35   : > { %p983_p13 = pnand %p982_p11, %p976_p1 }
  0x37   : > { %986 = shalt.err (!%p983_p13)
}
  0x38   : > { %s1244_s18 = smov 128   ;;  %s1245_s19 = smov 8  }
  0x39   : > { %847 = dma.hbm_to_vmem [thread:$0]  (!%p1359_p10), %s1704_s1, 512, %s1353_s11, [#allocation6], %s1244_s18, %s1244_s18, %s1245_s19  }
  0x3a   : > { %s1706_s2 = sld [smem:[#allocation22_spill]] }
  0x40   : > { %s987_s17 = scalar_lea.hbm %s1706_s2, 512 }
  0x41   : > { %p988_p1 = scmp.ne.s32.totalorder %s1706_s2, %s987_s17  ;;  %p994_p0 = scmp.lt.u32.totalorder %s987_s17, %s1706_s2 }
  0x43   : > { %p990_p2 = pnand %p988_p1, %p1375_p12 }
  0x45   : > { %p991_p6 = pneg %p990_p2 }
  0x47   : > { %p996_p3 = pnand %p994_p0, %p991_p6 }
  0x49   : > { %999 = shalt.err (!%p996_p3)
}
  0x4a   : > { %s1000_s11 = scalar_lea.vmem %s1363_s14, 512  ;;  %p1008_p11 = scmp.lt.s32.totalorder %s1363_s14, %s1363_s14 }
  0x4b   : > { %p1001_p5 = scmp.ne.s32.totalorder %s1363_s14, %s1000_s11  ;;  %p1009_p13 = scmp.lt.s32.totalorder %s1000_s11, %s1000_s11 }
  0x4d   : > { %p1003_p7 = pnand %p1001_p5, %p1375_p12  ;;  %p1010_p1 = por %p1009_p13, %p1008_p11 }
  0x4f   : > { %p1004_p9 = pneg %p1003_p7 }
  0x51   : > { %p1011_p2 = pnand %p1010_p1, %p1004_p9 }
  0x53   : > { %1014 = shalt.err (!%p1011_p2)
}
  0x54   : > { %850 = dma.hbm_to_vmem [thread:$0]  (!%p1359_p10), %s1706_s2, 512, %s1363_s14, [#allocation6], %s1244_s18, %s1244_s18, %s1245_s19  }
  0x55   : > { %s1707_s3 = sld [smem:[#allocation23_spill]] }
  0x5b   : > { %s1015_s20 = scalar_lea.hbm %s1707_s3, 512 }
  0x5c   : > { %p1016_p6 = scmp.ne.s32.totalorder %s1707_s3, %s1015_s20  ;;  %p1022_p5 = scmp.lt.u32.totalorder %s1015_s20, %s1707_s3 }
  0x5e   : > { %p1018_p0 = pnand %p1016_p6, %p1375_p12 }
  0x60   : > { %p1019_p3 = pneg %p1018_p0 }
  0x62   : > { %p1024_p7 = pnand %p1022_p5, %p1019_p3 }
  0x64   : > { %1027 = shalt.err (!%p1024_p7)
}
  0x65   : > { %s1028_s11 = scalar_lea.vmem %s259_s16, 512  ;;  %p1036_p1 = scmp.lt.s32.totalorder %s259_s16, %s259_s16 }
  0x66   : > { %p1029_p9 = scmp.ne.s32.totalorder %s259_s16, %s1028_s11  ;;  %p1037_p2 = scmp.lt.s32.totalorder %s1028_s11, %s1028_s11 }
  0x68   : > { %p1031_p11 = pnand %p1029_p9, %p1375_p12  ;;  %p1038_p4 = por %p1037_p2, %p1036_p1 }
  0x6a   : > { %p1032_p13 = pneg %p1031_p11 }
  0x6c   : > { %p1039_p8 = pnand %p1038_p4, %p1032_p13 }
  0x6e   : > { %1042 = shalt.err (!%p1039_p8)
}
  0x6f   : > { %853 = dma.hbm_to_vmem [thread:$0]  (!%p1359_p10), %s1707_s3, 512, %s259_s16, [#allocation9], %s1244_s18, %s1244_s18, %s1245_s19  }
  0x70   : > { %s37_s30 = sadd.s32 1, %s1231_s26  ;;  %s40_s12 = sadd.s32 1, %s1235_s27 }
  0x71   : > { %p38_p4 = scmp.ge.s32.totalorder %s37_s30, 2  ;;  %s49_s6 = sadd.s32 1, %s1219_s23 }
  0x72   : > { %p56_p8 = scmp.ne.s32.totalorder %s1219_s23, %s1215_s22  ;;  %p57_p12 = scmp.eq.s32.totalorder %s1239_s28, 0 }
  0x73   : > { %s1732_s30 = smov (%p38_p4, %s37_s30), 0  ;;  %s1734_s12 = smov (!%p38_p4, %s40_s12), %s1235_s27 }
  0x74   : > { %s45_s21 = ssub.s32 %s1231_s26, %s1732_s30  ;;  %p42_p6 = scmp.ge.s32.totalorder %s1734_s12, 2 }
  0x75   : > { %p1708_p0 = scmp.eq.s32.totalorder %s1328_s29, 3  ;;  %p1464_p10 = por %p57_p12, %p56_p8 }
  0x76   : > { %p871_p5 = scmp.lt.s32.totalorder %s1239_s28, 4  ;;  %s1736_s12 = smov (%p42_p6, %s1734_s12), 0 }
  0x77   : > { %p1460_p3 = por %p1708_p0, %p56_p8  ;;  %s272_s18 = sand.u32 1, %s1219_s23  }
  0x78   : > { %s764_s19 = sshll.u32 %s1235_s27, 1  ;;  %s44_s20 = ssub.s32 %s1235_s27, %s1736_s12 }
  0x79   : > { %s46_s10 = sor.u32 %s45_s21, %s44_s20  ;;  %s763_s13 = sshll.u32 %s272_s18, 3 }
  0x7a   : > { %p47_p7 = scmp.eq.s32.totalorder %s46_s10, 0  ;;  %s281_s15 = sadd.s32 %s1231_s26, %s764_s19 }
  0x7b   : > { %s276_s17 = scalar_lea.vmem [#allocation2], %s763_s13  ;;  %s765_s5 = sshll.u32 %s281_s15, 7 }
  0x7c   : > { %s285_s11 = sshll.u32 %s276_s17, 4  ;;  %s1484_s3 = scalar_lea.hbm %s1678_s0, %s765_s5  ;;  %s1479_s11 = int_to_ptr.vmem [resolvable:$true] %s285_s11 }
  0x7d   : > { %s1477_s14 = scalar_select %p47_p7, %s1219_s23, %s49_s6  }
  0x7e   : > { %p1490_p9 = pnand %p871_p5, %p1464_p10  ;;  %s273_s6 = scalar_lea.sflag [#allocation3], %s272_s18 }
  0x7f   : > { %s1043_s19 = scalar_lea.hbm %s1484_s3, 128  ;;  %s1048_s16 = scalar_lea.hbm %s1678_s0, 512 }
  0x80   : > { %p1044_p11 = scmp.ne.s32.totalorder %s1484_s3, %s1043_s19  ;;  %p1045_p13 = pneg %p1490_p9 }
  0x81   : > { %p1049_p4 = scmp.lt.u32.totalorder %s1484_s3, %s1678_s0  ;;  %p1050_p8 = scmp.lt.u32.totalorder %s1048_s16, %s1043_s19 }
  0x82   : > { %p1046_p1 = pnand %p1045_p13, %p1044_p11  ;;  %p1052_p6 = scmp.lt.u32.totalorder %s1043_s19, %s1484_s3 }
  0x83   : > { %p1051_p12 = por %p1050_p8, %p1049_p4 }
  0x84   : > { %p1047_p2 = pneg %p1046_p1 }
  0x85   : > { %p1053_p0 = por %p1052_p6, %p1051_p12 }
  0x87   : > { %p1054_p10 = pnand %p1053_p0, %p1047_p2 }
  0x89   : > { %1057 = shalt.err (!%p1054_p10)
}
  0x8a   : > { %s1058_s18 = scalar_lea.vmem %s1479_s11, 128  ;;  %s1246_s13 = smov [#allocation2]  }
  0x8b   : > { %p1059_p5 = scmp.ne.s32.totalorder %s1479_s11, %s1058_s18  ;;  %s1063_s15 = sshll.u32 %s1246_s13, 4  ;;  %s1064_s15 = int_to_ptr.vmem [resolvable:$false] %s1063_s15 }
  0x8c   : > { %s1065_s17 = scalar_lea.vmem %s1064_s15, 256  ;;  %p1066_p1 = scmp.lt.s32.totalorder %s1479_s11, %s1064_s15 }
  0x8d   : > { %p1061_p7 = pnand %p1059_p5, %p1045_p13  ;;  %p1067_p4 = scmp.lt.s32.totalorder %s1065_s17, %s1058_s18 }
  0x8f   : > { %p1062_p11 = pneg %p1061_p7  ;;  %p1068_p8 = por %p1067_p4, %p1066_p1 }
  0x91   : > { %p1069_p12 = pnand %p1068_p8, %p1062_p11 }
  0x93   : > { %1072 = shalt.err (!%p1069_p12)
}
  0x94   : > { %857 = dma.hbm_to_vmem [thread:$0]  (!%p1490_p9), %s1484_s3, 128, %s1479_s11, %s273_s6  }
  0x95   : > { %p1712_p2 = scmp.ne.s32.totalorder %s1702_s9, 0 }
  0x96   : > { %s1522_s5 = sand.u32 (!%p1712_p2), 1, %s1215_s22   ;;  %p1713_p13 = scmp.ne.s32.totalorder (!%p1712_p2), %s1699_s7, 0 }
  0x97   : > { %294 = sbr.rel (%p1712_p2) target bundleno = 478 (0x1de), region = 36  ;;  %s1525_s19 = sshll.u32 (!%p1712_p2), %s1522_s5, 3 }
  0x98   : > { %s297_s1 = scalar_lea.sflag (!%p1712_p2), [#allocation3], %s1522_s5  ;;  %s300_s2 = scalar_lea.vmem (!%p1712_p2), [#allocation2], %s1525_s19 }
  0x9e   : > { %1190 = dma.done.wait (%p1713_p13), %s297_s1, 128  }
  0x9f   : > { %1192 = vsyncadd (%p1713_p13), %s297_s1, 4294967168  ;;  %p1714_p9 = scmp.eq.s32.totalorder %s1328_s29, 0 }
  0xa1   : > { %1194 = dma.done.wait (%p1714_p9), [#allocation6], 1024   ;;  %p1715_p6 = pmov %p1714_p9 }
  0xa3   : > { %1196 = vsyncadd (%p1715_p6), [#allocation6], 4294966272  ;;  %p1716_p0 = pmov %p1715_p6 }
  0xa5   : > { %1198 = dma.done.wait (%p1716_p0), [#allocation9], 512   ;;  %p1717_p10 = pmov %p1716_p0 }
  0xa6   : > { %v1247_v0 = vmov 0.0   ;;  %vm1248_vm0 = vmmov 0   ;;  %v354_v1 = vld [vmem:[#allocation5] sm:$0xff]  ;;  %v355_v2 = vld [vmem:[#allocation5 + $0x8] sm:$0xff]  ;;  %v356_v6 = vld [vmem:[#allocation5 + $0x10] sm:$0xff]  ;;  %vm372_vm1 = vcmask 261120  }
  0xa7   : > { %1200 = vsyncadd (%p1717_p10), [#allocation9], 4294966784  ;;  %800 = vmatprep.subr.bf16.mxu0 %v1247_v0  ;;  %808 = vmatprep.subr.bf16.mxu1 %v1247_v0  ;;  %v360_v3 = vld [vmem:[#allocation7] sm:$0xff]  ;;  %v358_v4 = vpack.c.bf16 %v355_v2, %v354_v1  ;;  %v361_v5 = vld [vmem:[#allocation7 + $0x8] sm:$0xff]  ;;  %s783_s3 = sshll.u32 %s1227_s25, 1  ;;  %s526_s9 = sand.u32 1, %s1328_s29  }
  0xa8   : > { %804 = vmatprep.mubr.msk.bf16.mxu0 %vm1248_vm0, %v1247_v0  ;;  %812 = vmatprep.mubr.msk.bf16.mxu1 %vm1248_vm0, %v1247_v0  ;;  %v357_v7 = vld [vmem:[#allocation5 + $0x18] sm:$0xff]  ;;  %v364_v8 = vpack.c.bf16 %v361_v5, %v360_v3  ;;  %v362_v9 = vld [vmem:[#allocation7 + $0x10] sm:$0xff]  ;;  %v366_v14 = vld [vmem:[#allocation8] sm:$0xff]  ;;  %s543_s7 = sadd.s32 %s1223_s24, %s783_s3  ;;  %s336_s21 = scalar_lea.vmem [#allocation10], %s1525_s19  ;;  %vm503_vm2 = vcmask 523264  }
  0xa9   : > { %v363_v10 = vld [vmem:[#allocation7 + $0x18] sm:$0xff]  ;;  %801 = vmatpush3.bf16.msra.mxu0 %v358_v4  ;;  %v359_v11 = vpack.c.bf16 %v357_v7, %v356_v6  ;;  %v367_v15 = vld [vmem:[#allocation8 + $0x8] sm:$0xff]  ;;  %v368_v18 = vld [vmem:[#allocation8 + $0x10] sm:$0xff]  ;;  %s1553_s11 = sshll.u32 %s543_s7, 7  ;;  %s547_s6 = sshll.u32 %s336_s21, 4  ;;  %s1563_s6 = int_to_ptr.vmem [resolvable:$true] %s547_s6 }
  0xaa   : > { %v352_v12 = vld [vmem:[%s300_s2] sm:$0xff]  ;;  %809 = vmatpush3.bf16.msra.mxu1 %v364_v8  ;;  %802 = vmatprep.subr.bf16.mxu0 %v1247_v0  ;;  %v365_v13 = vpack.c.bf16 %v363_v10, %v362_v9  ;;  %v370_v17 = vpack.c.bf16 %v367_v15, %v366_v14  ;;  %s343_s16 = scalar_lea.vmem [#allocation11], %s1525_s19  ;;  %s1561_s24 = scalar_lea.hbm %s1682_s4, %s1553_s11 }
  0xab   : > { %810 = vmatprep.subr.bf16.mxu1 %v1247_v0  ;;  %v353_v16 = vpack.c.bf16 %v352_v12, %v352_v12  ;;  %v369_v19 = vld [vmem:[#allocation8 + $0x18] sm:$0xff]  ;;  %s562_s20 = sshll.u32 %s343_s16, 4  ;;  %s1718_s15 = sld [smem:[#allocation24_spill]]  ;;  %s1571_s20 = int_to_ptr.vmem [resolvable:$true] %s562_s20 }
  0xac   : > { %v371_v20 = vpack.c.bf16 %v369_v19, %v368_v18  ;;  %s522_s1 = scalar_lea.sflag [#allocation4], %s1522_s5  ;;  %s1073_s2 = scalar_lea.vmem %s1563_s6, 128 }
  0xad   : > { %803 = vmatpush3.bf16.msra.mxu0 %v359_v11  ;;  %p1074_p5 = scmp.ne.s32.totalorder %s1563_s6, %s1073_s2  ;;  %s1249_s3 = smov [#allocation10]  }
  0xae   : > { %811 = vmatpush3.bf16.msra.mxu1 %v365_v13  ;;  %816 = vmatprep.subr.bf16.mxu0 %v1247_v0  ;;  %s1077_s7 = sshll.u32 %s1249_s3, 4  ;;  %s1078_s7 = int_to_ptr.vmem [resolvable:$false] %s1077_s7 }
  0xaf   : > { %p1075_p7 = pnand %p1074_p5, %p1460_p3  ;;  %s1079_s25 = scalar_lea.vmem %s1078_s7, 256 }
  0xb0   : > { %805 = vmatmul.mubr.msk.bf16.vlgmr.msra.gmra.mrb[0].mxu0 %vm372_vm1, %v353_v16  ;;  %p1080_p1 = scmp.lt.s32.totalorder %s1563_s6, %s1078_s7  ;;  %p1081_p4 = scmp.lt.s32.totalorder %s1079_s25, %s1073_s2 }
  0xb1   : > { %813 = vmatmul.mubr.msk.bf16.vlgmr.msra.gmra.mrb[0].mxu1 %vm372_vm1, %v353_v16  ;;  %817 = vmatpush3.bf16.msra.mxu0 %v370_v17  ;;  %s1569_s17 = scalar_lea.hbm %s1718_s15, %s1553_s11  ;;  %p1076_p11 = pneg %p1075_p7 }
  0xb2   : > { %818 = vmatprep.subr.bf16.mxu0 %v1247_v0  ;;  %820 = vmatprep.mubr.msk.bf16.mxu0 %vm1248_vm0, %v1247_v0  ;;  %p1082_p8 = por %p1081_p4, %p1080_p1 }
  0xb4   : > { %p1083_p12 = pnand %p1082_p8, %p1076_p11 }
  0xb5   : > { %819 = vmatpush3.bf16.msra.mxu0 %v371_v20 }
  0xb8   : > { %821 = vmatmul.mubr.msk.bf16.vlgmr.msra.gmra.mrb[4].mxu0 %vm372_vm1, %v353_v16 }
 0x183   : > { %v410_v21 = vpop.f32.mrb[0].mxu0 }
 0x184   : > { %v777_v22 = vmul.f32 -1.442695, %v410_v21  ;;  %v450_v23 = vpop.f32.mrb[0].mxu1  ;;  %v806_v24 = vpop.f32.mrb[1].mxu0 }
 0x185   : > { %v778_v25 = vmul.f32 -1.442695, %v450_v23  ;;  %v413_v26 = vpop.f32.mrb[2].mxu0  ;;  %v814_v27 = vpop.f32.mrb[1].mxu1 }
 0x186   : > { %947 = vpow2.f32 %v777_v22  ;;  %v807_v28 = vpop.f32.mrb[3].mxu0  ;;  %v453_v29 = vpop.f32.mrb[2].mxu1 }
 0x187   : > { %949 = vpow2.f32 %v778_v25  ;;  %v815_v30 = vpop.f32.mrb[3].mxu1 }
 0x18b   : > { %v1547_v31 = vpop.f32.mrb[4].mxu0 }
 0x18c   : > { %v779_v32 = vmul.f32 -1.442695, %v1547_v31  ;;  %v822_v33 = vpop.f32.mrb[5].mxu0 }
 0x18d   : > { %v493_v34 = vpop.f32.mrb[6].mxu0 }
 0x18e   : > { %951 = vpow2.f32 %v779_v32  ;;  %v823_v35 = vpop.f32.mrb[7].mxu0 }
 0x190   : > { %v948_v36 = vpop.eup %947 }
 0x191   : > { %v950_v37 = vpop.eup %949  ;;  %v499_v38 = vadd.f32 1.0, %v948_v36 }
 0x192   : > { %v508_v39 = vadd.f32 1.0, %v950_v37 }
 0x193   : > { %953 = vrcp.f32 %v499_v38 }
 0x194   : > { %955 = vrcp.f32 %v508_v39 }
 0x198   : > { %v952_v40 = vpop.eup %951 }
 0x199   : > { %v516_v41 = vadd.f32 1.0, %v952_v40 }
 0x19b   : > { %957 = vrcp.f32 %v516_v41 }
 0x19d   : > { %v954_v42 = vpop.eup %953 }
 0x19e   : > { %v956_v43 = vpop.eup %955  ;;  %v502_v44 = vmul.f32 %v954_v42, %v410_v21 }
 0x19f   : > { %v511_v45 = vmul.f32 %v956_v43, %v450_v23 }
 0x1a0   : > { %504 = vst.msk [vmem:[%s336_s21] sm:$0xff] %vm503_vm2, %v502_v44 }
 0x1a1   : > { %512 = vst.msk [vmem:[%s343_s16] sm:$0xff] %vm503_vm2, %v511_v45 }
 0x1a2   : > { %1086 = shalt.err (!%p1083_p12)
}
 0x1a3   : > { %s1087_s5 = scalar_lea.hbm %s1561_s24, 128  ;;  %s1091_s10 = scalar_lea.hbm %s1682_s4, 512 }
 0x1a4   : > { %p1088_p2 = scmp.ne.s32.totalorder %s1561_s24, %s1087_s5  ;;  %p1092_p6 = scmp.lt.u32.totalorder %s1561_s24, %s1682_s4 }
 0x1a5   : > { %p1093_p0 = scmp.lt.u32.totalorder %s1091_s10, %s1087_s5  ;;  %p1095_p5 = scmp.lt.u32.totalorder %s1087_s5, %s1561_s24 }
 0x1a6   : > { %p1089_p13 = pnand %p1088_p2, %p1460_p3 }
 0x1a7   : > { %p1094_p10 = por %p1093_p0, %p1092_p6 }
 0x1a8   : > { %p1090_p9 = pneg %p1089_p13 }
 0x1a9   : > { %p1096_p7 = por %p1095_p5, %p1094_p10 }
 0x1ab   : > { %p1097_p11 = pnand %p1096_p7, %p1090_p9 }
 0x1ad   : > { %1100 = shalt.err (!%p1097_p11)
}
 0x1ae   : > { %838 = dma.vmem_to_hbm [thread:$0]  (%p1460_p3), %s1563_s6, 128, %s1561_s24, %s522_s1  }
 0x1af   : > { %s1597_s2 = scalar_lea.sflag [#allocation12], %s526_s9  ;;  %s1101_s3 = scalar_lea.vmem %s1571_s20, 128 }
 0x1b0   : > { %p1102_p1 = scmp.ne.s32.totalorder %s1571_s20, %s1101_s3  ;;  %s1250_s7 = smov [#allocation11]  }
 0x1b1   : > { %s1105_s25 = sshll.u32 %s1250_s7, 4  ;;  %s1106_s25 = int_to_ptr.vmem [resolvable:$false] %s1105_s25 }
 0x1b2   : > { %p1103_p4 = pnand %p1102_p1, %p1460_p3  ;;  %s1107_s5 = scalar_lea.vmem %s1106_s25, 256 }
 0x1b3   : > { %p1108_p12 = scmp.lt.s32.totalorder %s1571_s20, %s1106_s25  ;;  %p1109_p2 = scmp.lt.s32.totalorder %s1107_s5, %s1101_s3 }
 0x1b4   : > { %p1104_p8 = pneg %p1103_p4 }
 0x1b5   : > { %p1110_p13 = por %p1109_p2, %p1108_p12 }
 0x1b7   : > { %p1111_p9 = pnand %p1110_p13, %p1104_p8 }
 0x1b9   : > { %1114 = shalt.err (!%p1111_p9)
}
 0x1ba   : > { %s1115_s29 = scalar_lea.hbm %s1569_s17, 128  ;;  %s1119_s24 = scalar_lea.hbm %s1718_s15, 512 }
 0x1bb   : > { %p1116_p6 = scmp.ne.s32.totalorder %s1569_s17, %s1115_s29  ;;  %p1120_p5 = scmp.lt.u32.totalorder %s1569_s17, %s1718_s15 }
 0x1bc   : > { %p1121_p7 = scmp.lt.u32.totalorder %s1119_s24, %s1115_s29  ;;  %p1123_p1 = scmp.lt.u32.totalorder %s1115_s29, %s1569_s17 }
 0x1bd   : > { %p1117_p0 = pnand %p1116_p6, %p1460_p3 }
 0x1be   : > { %p1122_p11 = por %p1121_p7, %p1120_p5 }
 0x1bf   : > { %p1118_p10 = pneg %p1117_p0 }
 0x1c0   : > { %p1124_p4 = por %p1123_p1, %p1122_p11 }
 0x1c2   : > { %p1125_p8 = pnand %p1124_p4, %p1118_p10 }
 0x1c4   : > { %1128 = shalt.err (!%p1125_p8)
}
 0x1c5   : > { %839 = dma.vmem_to_hbm [thread:$0]  (%p1460_p3), %s1571_s20, 128, %s1569_s17, %s1597_s2   ;;  %v958_v46 = vpop.eup %957 }
 0x1c6   : > { %s350_s16 = scalar_lea.vmem [#allocation13], %s1525_s19  ;;  %v519_v47 = vmul.f32 %v958_v46, %v1547_v31  ;;  %s1719_s3 = sld [smem:[#allocation25_spill]] }
 0x1c7   : > { %s577_s10 = sshll.u32 %s350_s16, 4  ;;  %s1251_s5 = smov [#allocation13]   ;;  %s578_s10 = int_to_ptr.vmem [resolvable:$true] %s577_s10 }
 0x1c8   : > { %520 = vst.msk [vmem:[%s350_s16] sm:$0xff] %vm372_vm1, %v519_v47  ;;  %s1129_s25 = scalar_lea.vmem %s578_s10, 128  ;;  %s1133_s20 = sshll.u32 %s1251_s5, 4  ;;  %s1134_s20 = int_to_ptr.vmem [resolvable:$false] %s1133_s20 }
 0x1c9   : > { %p1130_p12 = scmp.ne.s32.totalorder %s578_s10, %s1129_s25  ;;  %s1135_s19 = scalar_lea.vmem %s1134_s20, 256 }
 0x1ca   : > { %p1136_p9 = scmp.lt.s32.totalorder %s578_s10, %s1134_s20  ;;  %p1137_p6 = scmp.lt.s32.totalorder %s1135_s19, %s1129_s25 }
 0x1cb   : > { %p1131_p2 = pnand %p1130_p12, %p1460_p3 }
 0x1cc   : > { %s1627_s7 = scalar_lea.hbm %s1719_s3, %s1553_s11  ;;  %p1138_p0 = por %p1137_p6, %p1136_p9 }
 0x1cd   : > { %p1132_p13 = pneg %p1131_p2 }
 0x1cf   : > { %p1139_p10 = pnand %p1138_p0, %p1132_p13 }
 0x1d1   : > { %1142 = shalt.err (!%p1139_p10)
}
 0x1d2   : > { %s1143_s11 = scalar_lea.hbm %s1627_s7, 128  ;;  %s1147_s9 = scalar_lea.hbm %s1719_s3, 512 }
 0x1d3   : > { %p1144_p5 = scmp.ne.s32.totalorder %s1627_s7, %s1143_s11  ;;  %p1148_p1 = scmp.lt.u32.totalorder %s1627_s7, %s1719_s3 }
 0x1d4   : > { %p1149_p4 = scmp.lt.u32.totalorder %s1147_s9, %s1143_s11  ;;  %p1151_p12 = scmp.lt.u32.totalorder %s1143_s11, %s1627_s7 }
 0x1d5   : > { %p1145_p7 = pnand %p1144_p5, %p1460_p3 }
 0x1d6   : > { %p1150_p8 = por %p1149_p4, %p1148_p1 }
 0x1d7   : > { %p1146_p11 = pneg %p1145_p7 }
 0x1d8   : > { %p1152_p2 = por %p1151_p12, %p1150_p8 }
 0x1da   : > { %p1153_p13 = pnand %p1152_p2, %p1146_p11 }
 0x1dc   : > { %1156 = shalt.err (!%p1153_p13)
}
 0x1dd   : > { %840 = dma.vmem_to_hbm [thread:$0]  (%p1460_p3), %s578_s10, 128, %s1627_s7, %s1597_s2  }
 0x1de PF: > { %s1720_s1 = sld [smem:[#allocation19_spill]]  ;;  %s1721_s21 = sld [smem:[#allocation20_spill]] }
 0x1df   : > { %p875_p9 = scmp.ge.s32.totalorder %s1239_s28, 2 }
 0x1e4   : > { %s589_s16 = sand.u32 1, %s1720_s1   ;;  %p1722_p6 = scmp.ne.s32.totalorder %s1721_s21, 0 }
 0x1e5   : > { %s590_s18 = scalar_lea.sflag [#allocation4], %s589_s16 }
 0x1e6   : > { %p859_p0 = pnand %p875_p9, %p1722_p6 }
 0x1e8   : > { %1202 = dma.done.wait (!%p859_p0), %s590_s18, 128  }
 0x1e9   : > { %1204 = vsyncadd (!%p859_p0), %s590_s18, 4294967168  ;;  %s1723_s13 = sadd.s32 4294967294, %s1239_s28  }
 0x1ea   : > { %s598_s25 = sand.u32 1, %s1723_s13  }
 0x1eb   : > { %s599_s5 = scalar_lea.sflag [#allocation12], %s598_s25 }
 0x1ec   : > { %1206 = dma.done.wait (!%p859_p0), %s599_s5, 256  }
 0x1ed   : > { %1208 = vsyncadd (!%p859_p0), %s599_s5, 4294967040  ;;  %s28_s28 = sadd.s32 1, %s1239_s28   ;;  %s1724_s21 = smov %s1215_s22 }
 0x1ee   : > { %p25_p3 = scmp.ge.s32.totalorder %s28_s28, 6   ;;  %s1725_s22 = smov %s1219_s23 }
 0x1ef   : > { %s1726_s23 = smov %s1477_s14  ;;  %s1727_s24 = smov %s1231_s26 }
 0x1f0   : > { %s1728_s25 = smov %s1235_s27  ;;  %s1729_s26 = smov %s1732_s30 }
 0x1f1   : > { %s1730_s27 = smov %s1736_s12  ;;  %27 = sbr.rel (!%p25_p3) target bundleno = 17 (0x11), region = 125 }
 0x1f8   :  { %613 = vsyncpa [#allocation3], 1 }
 0x1f9   :  { %615 = vsyncpa [#allocation3 + $0x1], 1 }
 0x1fa   :  { %616 = vsyncpa [#allocation6], 1 }
 0x1fb   :  { %617 = vsyncpa [#allocation9], 1 }
 0x1fc   :  { %618 = vsyncpa [#allocation4], 1 }
 0x1fd   :  { %620 = vsyncpa [#allocation4 + $0x1], 1 }
 0x1fe   :  { %621 = vsyncpa [#allocation12], 1 }
 0x1ff   :  { %623 = vsyncpa [#allocation12 + $0x1], 1 }

</bundles_post_ra>
